<compile_context>
chip_gen: v5e
topology: v5e:2x2
jax: 0.10.0
libtpu: 0.0.40
codegen_flags: <defaults>
</compile_context>

<pallas_src>
import functools

import jax
import jax.numpy as jnp
from jax.experimental import pallas as pl
from jax.experimental.pallas import tpu as pltpu


def _round_up(n: int, m: int) -> int:
    return ((n + m - 1) // m) * m


def _layernorm_kernel(alpha_ref, bias_ref, x_ref, o_ref, *, eps, d):
    # x_ref: (tm, D) tile in VMEM; alpha/bias: (1,1) scalars in SMEM.
    x = x_ref[...].astype(jnp.float32)

    # One-pass statistics: sum and sum-of-squares -> mean and unbiased variance.
    s1 = jnp.sum(x, axis=-1, keepdims=True)
    s2 = jnp.sum(x * x, axis=-1, keepdims=True)
    mean = s1 * (1.0 / d)
    var = jnp.maximum((s2 - s1 * mean) * (1.0 / (d - 1)), 0.0)  # Bessel, clamp rounding
    std = jnp.sqrt(var)
    denom = std + eps

    # Per-row reciprocal on the EUP (approx) + one Newton step back to full f32
    # precision. This replaces a (tm, D) VPU divide with a (tm, 1) op.
    inv = pl.reciprocal(denom, approx=True)
    inv = inv * (2.0 - denom * inv)

    scale = alpha_ref[0, 0] * inv          # fold alpha into the per-row scale
    o_ref[...] = ((x - mean) * scale + bias_ref[0, 0]).astype(o_ref.dtype)


def layer_normalization(x, alpha, bias, eps=1e-6, tm=None):
    """x: (..., D). alpha, bias: scalar params (shape (1,)), as in the PyTorch module."""
    if x is None:
        raise ValueError("Input tensor 'x' is None!")
    if x.shape[0] == 0:
        raise ValueError("Input tensor 'x' is empty!")

    orig_shape = x.shape
    d = orig_shape[-1]
    assert d >= 2, "unbiased std (torch default) needs >= 2 elements on the last axis"

    x2 = x.reshape(-1, d)
    rows = x2.shape[0]
    itemsize = jnp.dtype(x.dtype).itemsize
    row_align = 8 if itemsize >= 4 else 16          # sublane packing for sub-32-bit dtypes

    if tm is None:
        # Budget ~40 MiB for 2x double-buffered input + 2x output tiles plus the f32
        # temporaries inside the kernel; leaves headroom on v7x's 64 MiB VMEM.
        bytes_per_row = d * (4 * itemsize + 2 * 4)
        budget = 40 * 1024 * 1024
        tm = max(row_align, min(512, budget // max(bytes_per_row, 1)))
        tm = (tm // row_align) * row_align
    # Never tile larger than the (aligned) input itself.
    tm = min(tm, _round_up(rows, row_align))

    rows_padded = _round_up(rows, tm)
    if rows_padded != rows:
        # Padded rows are all-zero: mean=0, std=0 -> finite output (eps keeps the
        # reciprocal finite); they are sliced off below.
        x2 = jnp.pad(x2, ((0, rows_padded - rows), (0, 0)))

    alpha2 = jnp.asarray(alpha, jnp.float32).reshape(1, 1)
    bias2 = jnp.asarray(bias, jnp.float32).reshape(1, 1)

    kernel = functools.partial(_layernorm_kernel, eps=eps, d=d)

    cost = pl.CostEstimate(
        flops=5 * rows_padded * d,
        transcendentals=2 * rows_padded,                  # sqrt + reciprocal per row
        bytes_accessed=2 * rows_padded * d * itemsize,    # read + write stream
    )

    out = pl.pallas_call(
        kernel,
        out_shape=jax.ShapeDtypeStruct((rows_padded, d), x.dtype),
        grid_spec=pltpu.PrefetchScalarGridSpec(
            num_scalar_prefetch=0,
            grid=(rows_padded // tm,),
            in_specs=[
                pl.BlockSpec((1, 1), lambda i: (0, 0),
                             memory_space=pltpu.MemorySpace.SMEM),
                pl.BlockSpec((1, 1), lambda i: (0, 0),
                             memory_space=pltpu.MemorySpace.SMEM),
                pl.BlockSpec((tm, d), lambda i: (i, 0)),
            ],
            out_specs=pl.BlockSpec((tm, d), lambda i: (i, 0)),
        ),
        compiler_params=pltpu.CompilerParams(
            dimension_semantics=("parallel",),            # shard row-grid across TCs
            vmem_limit_bytes=56 * 1024 * 1024,            # above default, < v7x physical
        ),
        cost_estimate=cost,
    )(alpha2, bias2, x2)

    if rows_padded != rows:
        out = out[:rows]
    return out.reshape(orig_shape)


if __name__ == "__main__":
    key = jax.random.PRNGKey(0)
    B, S, D = 2, 8, 32
    x = jax.random.normal(key, (B, S, D), dtype=jnp.float32)

    # Deterministic parameter init, matching nn.Parameter(torch.ones(1)).
    alpha = jnp.ones((1,), jnp.float32)
    bias = jnp.ones((1,), jnp.float32)
    eps = 1e-6

    y = layer_normalization(x, alpha, bias, eps)
    y = jax.block_until_ready(y)

    # Reference in plain JAX (unbiased std, like torch.Tensor.std default).
    mean = jnp.mean(x, axis=-1, keepdims=True)
    std = jnp.sqrt(jnp.sum((x - mean) ** 2, axis=-1, keepdims=True) / (D - 1))
    ref = alpha[0] * (x - mean) / (std + eps) + bias[0]
    assert jnp.allclose(y, ref, atol=1e-5, rtol=1e-5), float(jnp.max(jnp.abs(y - ref)))

    # Ragged-row path (rows not divisible by the tile): exercise padding branch.
    x_odd = jax.random.normal(key, (3, 7, D), dtype=jnp.float32)
    y_odd = jax.block_until_ready(layer_normalization(x_odd, alpha, bias, eps))
    mean_o = jnp.mean(x_odd, axis=-1, keepdims=True)
    std_o = jnp.sqrt(jnp.sum((x_odd - mean_o) ** 2, axis=-1, keepdims=True) / (D - 1))
    ref_o = alpha[0] * (x_odd - mean_o) / (std_o + eps) + bias[0]
    assert jnp.allclose(y_odd, ref_o, atol=1e-5, rtol=1e-5)

    print("KERNEL_OK")
</pallas_src>

<mosaic_0001>
module attributes {stable_mosaic.version = 11 : i64} {
  func.func @_layernorm_kernel(%arg0: i32, %arg1: memref<1x1xf32, #tpu.memory_space<smem>>, %arg2: memref<1x1xf32, #tpu.memory_space<smem>>, %arg3: memref<16x32xf32, #tpu.memory_space<vmem>>, %arg4: memref<16x32xf32, #tpu.memory_space<vmem>>) attributes {dimension_semantics = [#tpu.dimension_semantics<parallel>], iteration_bounds = array<i64: 1>, scalar_prefetch = 0 : i64, scratch_operands = 0 : i64, tpu.core_type = #tpu.core_type<tc>, window_params = [{transform_indices = @transform_0, window_bounds = array<i64: 1, 1>}, {transform_indices = @transform_1, window_bounds = array<i64: 1, 1>}, {transform_indices = @transform_2, window_bounds = array<i64: 16, 32>}, {transform_indices = @transform_3, window_bounds = array<i64: 16, 32>}]} {
    %c0 = arith.constant 0 : index
    %c0_0 = arith.constant 0 : index
    %0 = vector.load %arg3[%c0, %c0_0] : memref<16x32xf32, #tpu.memory_space<vmem>>, vector<16x32xf32>
    %cst = arith.constant dense<0.000000e+00> : vector<16xf32>
    %1 = vector.multi_reduction <add>, %0, %cst [1] : vector<16x32xf32> to vector<16xf32>
    %2 = vector.shape_cast %1 : vector<16xf32> to vector<16x1xf32>
    %3 = arith.mulf %0, %0 : vector<16x32xf32>
    %cst_1 = arith.constant dense<0.000000e+00> : vector<16xf32>
    %4 = vector.multi_reduction <add>, %3, %cst_1 [1] : vector<16x32xf32> to vector<16xf32>
    %5 = vector.shape_cast %4 : vector<16xf32> to vector<16x1xf32>
    %cst_2 = arith.constant 3.125000e-02 : f32
    %6 = vector.broadcast %cst_2 : f32 to vector<16x1xf32>
    %7 = arith.mulf %2, %6 : vector<16x1xf32>
    %8 = arith.mulf %2, %7 : vector<16x1xf32>
    %9 = arith.subf %5, %8 : vector<16x1xf32>
    %cst_3 = arith.constant 0.0322580636 : f32
    %10 = vector.broadcast %cst_3 : f32 to vector<16x1xf32>
    %11 = arith.mulf %9, %10 : vector<16x1xf32>
    %cst_4 = arith.constant 0.000000e+00 : f32
    %12 = vector.broadcast %cst_4 : f32 to vector<16x1xf32>
    %13 = arith.maximumf %11, %12 : vector<16x1xf32>
    %14 = math.sqrt %13 : vector<16x1xf32>
    %cst_5 = arith.constant 9.99999997E-7 : f32
    %15 = vector.broadcast %cst_5 : f32 to vector<16x1xf32>
    %16 = arith.addf %14, %15 : vector<16x1xf32>
    %17 = tpu.reciprocal %16 {approx = true} : vector<16x1xf32> -> vector<16x1xf32>
    %18 = arith.mulf %16, %17 : vector<16x1xf32>
    %cst_6 = arith.constant 2.000000e+00 : f32
    %19 = vector.broadcast %cst_6 : f32 to vector<16x1xf32>
    %20 = arith.subf %19, %18 : vector<16x1xf32>
    %21 = arith.mulf %17, %20 : vector<16x1xf32>
    %c0_7 = arith.constant 0 : index
    %c0_8 = arith.constant 0 : index
    %22 = memref.load %arg1[%c0_7, %c0_8] : memref<1x1xf32, #tpu.memory_space<smem>>
    %23 = vector.broadcast %22 : f32 to vector<16x1xf32>
    %24 = arith.mulf %23, %21 : vector<16x1xf32>
    %25 = vector.broadcast %7 : vector<16x1xf32> to vector<16x32xf32>
    %26 = arith.subf %0, %25 : vector<16x32xf32>
    %27 = vector.broadcast %24 : vector<16x1xf32> to vector<16x32xf32>
    %28 = arith.mulf %26, %27 : vector<16x32xf32>
    %c0_9 = arith.constant 0 : index
    %c0_10 = arith.constant 0 : index
    %29 = memref.load %arg2[%c0_9, %c0_10] : memref<1x1xf32, #tpu.memory_space<smem>>
    %30 = vector.broadcast %29 : f32 to vector<16x32xf32>
    %31 = arith.addf %28, %30 : vector<16x32xf32>
    %c0_11 = arith.constant 0 : index
    %c0_12 = arith.constant 0 : index
    %32 = vector.load %arg4[%c0_11, %c0_12] : memref<16x32xf32, #tpu.memory_space<vmem>>, vector<16x32xf32>
    tpu.vector_store %arg4[%c0_11, %c0_12], %31 {strides = array<i32>} : memref<16x32xf32, #tpu.memory_space<vmem>>, vector<16x32xf32>,
    return
  }
  func.func @transform_0(%arg0: i32) -> (i32, i32) {
    %c0_i32 = arith.constant 0 : i32
    %c0_i32_0 = arith.constant 0 : i32
    %c0_i32_1 = arith.constant 0 : i32
    return %c0_i32, %c0_i32_0 : i32, i32
  }
  func.func @transform_1(%arg0: i32) -> (i32, i32) {
    %c0_i32 = arith.constant 0 : i32
    %c0_i32_0 = arith.constant 0 : i32
    %c0_i32_1 = arith.constant 0 : i32
    return %c0_i32, %c0_i32_0 : i32, i32
  }
  func.func @transform_2(%arg0: i32) -> (i32, i32) {
    %c0_i32 = arith.constant 0 : i32
    %c0_i32_0 = arith.constant 0 : i32
    return %arg0, %c0_i32 : i32, i32
  }
  func.func @transform_3(%arg0: i32) -> (i32, i32) {
    %c0_i32 = arith.constant 0 : i32
    %c0_i32_0 = arith.constant 0 : i32
    return %arg0, %c0_i32 : i32, i32
  }
}

</mosaic_0001>

<bundles_post_ra>
// kernel: tpu_custom_call.1
= control target key start
LH: loop header
LB: loop body
LE: loop exit
PB: predicated region body
PF: predicated region fallthrough
CT: control target
= control target key end

     0   :  { %10 = vsyncpa [#allocation5], 0  ;;  %s251_s0 = inlined_call_operand.<no memory space> [shape: f32[1,1], index: 0, kind: input, shape index: {}]   ;;  %s252_s1 = inlined_call_operand.<no memory space> [shape: f32[1,1], index: 1, kind: input, shape index: {}]   ;;  %s253_s2 = inlined_call_operand.hbm [shape: f32[16,32], index: 2, kind: input, shape index: {}]   ;;  %s254_s3 = inlined_call_operand.hbm [shape: f32[16,32], index: 3, kind: output, shape index: {}]  }
   0x1   :  { %11 = vsyncpa [#allocation6], 0  ;;  %s20_s14 = sshll.u32 %s253_s2, 4  ;;  %s191_s15 = smov [#allocation4]   ;;  %s21_s14 = int_to_ptr.hbm [resolvable:$true] %s20_s14 }
   0x2   :  { %s22_s16 = sshll.u32 %s191_s15, 4  ;;  %s192_s17 = smov 128   ;;  %s23_s16 = int_to_ptr.vmem [resolvable:$true] %s22_s16 }
   0x3   :  { %s193_s18 = smov 8  }
   0x4   :  { %28 = dma.hbm_to_vmem [thread:$0]  %s21_s14, 256, %s23_s16, [#allocation5], %s192_s17, %s192_s17, %s193_s18  }
   0x5   :  { %187 = dma.done.wait [#allocation5], 256  }
   0x6   :  { %188 = vsyncadd [#allocation5], 4294967040  ;;  %vm35_vm0 = vcmask 261120   ;;  %v221_v0 = vld [vmem:[#allocation4] sm:$0xff]  ;;  %v228_v4 = vld [vmem:[#allocation4 + $0x8] sm:$0xff]  ;;  %v95_v47 = vstv %s251_s0  ;;  %v103_v52 = vstv %s252_s1  ;;  %s194_s0 = smov [#allocation7]  }
   0x7   :  { %v36_v1 = vsel %vm35_vm0, %v221_v0, 0.0  ;;  %v42_v2 = vmul.f32 %v221_v0, %v221_v0  ;;  %v43_v5 = vmul.f32 %v228_v4, %v228_v4  ;;  %v39_v6 = vsel %vm35_vm0, %v228_v4, 0.0  ;;  %s112_s22 = sshll.u32 %s194_s0, 4  ;;  %s114_s25 = sshll.u32 %s254_s3, 4  ;;  %s113_s22 = int_to_ptr.vmem [resolvable:$true] %s112_s22  ;;  %s115_s25 = int_to_ptr.hbm [resolvable:$true] %s114_s25 }
   0x8   :  { %37 = vadd.xlane.f32.xlu0 %v36_v1 }
   0x9   :  { %v44_v3 = vsel %vm35_vm0, %v42_v2, 0.0  ;;  %v47_v7 = vsel %vm35_vm0, %v43_v5, 0.0 }
   0xa   :  { %45 = vadd.xlane.f32.xlu1 %v44_v3 }
  0x10   :  { %40 = vadd.xlane.f32.xlu0 %v39_v6 }
  0x12   :  { %48 = vadd.xlane.f32.xlu1 %v47_v7 }
  0x7b   :  { %v38_v8 = vpop.xlane.xlu0 %37 }
  0x7c   :  { %v50_v9 = vmul.f32 0.03125, %v38_v8 }
  0x7d   :  { %v46_v10 = vpop.xlane.xlu1 %45 }
  0x7e   :  { %v52_v11 = vmul.f32 %v50_v9, %v38_v8  ;;  %v98_v49 = vsub.f32 %v221_v0, %v50_v9 }
  0x80   :  { %v54_v12 = vsub.f32 %v46_v10, %v52_v11 }
  0x82   :  { %v56_v13 = vmul.f32 0.032258064, %v54_v12 }
  0x83   :  { %v41_v14 = vpop.xlane.xlu0 %40 }
  0x84   :  { %v58_v15 = vmax.f32 %v56_v13, 0.0  ;;  %v51_v16 = vmul.f32 0.03125, %v41_v14 }
  0x85   :  { %v49_v17 = vpop.xlane.xlu1 %48 }
  0x86   :  { %131 = vrsqrt.f32 %v58_v15  ;;  %v53_v18 = vmul.f32 %v51_v16, %v41_v14  ;;  %vm67_vm1 = vcmp.eq.f32.partialorder %v58_v15, inf  ;;  %v70_v32 = vand.u32 2147483648, %v58_v15 }
  0x87   :  { %vm69_vm2 = vcmp.eq.f32.partialorder %v58_v15, 0.0  ;;  %v99_v58 = vsub.f32 %v228_v4, %v51_v16 }
  0x88   :  { %v55_v19 = vsub.f32 %v49_v17, %v53_v18 }
  0x8a   :  { %v57_v20 = vmul.f32 0.032258064, %v55_v19 }
  0x8c   :  { %v132_v21 = vpop.eup %131  ;;  %v59_v22 = vmax.f32 %v57_v20, 0.0 }
  0x8d   :  { %v61_v23 = vmul.f32 %v132_v21, %v58_v15 }
  0x8e   :  { %133 = vrsqrt.f32 %v59_v22  ;;  %vm79_vm3 = vcmp.eq.f32.partialorder %v59_v22, inf  ;;  %v82_v40 = vand.u32 2147483648, %v59_v22  ;;  %vm81_vm4 = vcmp.eq.f32.partialorder %v59_v22, 0.0 }
  0x8f   :  { %v62_v24 = vmul.f32 %v132_v21, %v61_v23 }
  0x91   :  { %v63_v25 = vmul.f32 0.5, %v62_v24 }
  0x93   :  { %v64_v26 = vsub.f32 1.5, %v63_v25 }
  0x94   :  { %v134_v27 = vpop.eup %133 }
  0x95   :  { %v65_v28 = vmul.f32 %v132_v21, %v64_v26  ;;  %v73_v29 = vmul.f32 %v134_v27, %v59_v22 }
  0x97   :  { %v66_v30 = vmul.f32 %v65_v28, %v58_v15  ;;  %v74_v31 = vmul.f32 %v134_v27, %v73_v29 }
  0x99   :  { %v75_v33 = vmul.f32 0.5, %v74_v31  ;;  %v68_v34 = vsel %vm67_vm1, %v58_v15, %v66_v30 }
  0x9a   :  { %v71_v35 = vsel %vm69_vm2, %v70_v32, %v68_v34 }
  0x9b   :  { %v76_v36 = vsub.f32 1.5, %v75_v33  ;;  %v84_v37 = vadd.f32 1e-06, %v71_v35 }
  0x9d   :  { %v77_v38 = vmul.f32 %v134_v27, %v76_v36  ;;  %135 = vrcp.f32 %v84_v37 }
  0x9f   :  { %v78_v39 = vmul.f32 %v77_v38, %v59_v22 }
  0xa1   :  { %v80_v41 = vsel %vm79_vm3, %v59_v22, %v78_v39 }
  0xa2   :  { %v83_v42 = vsel %vm81_vm4, %v82_v40, %v80_v41 }
  0xa3   :  { %v136_v43 = vpop.eup %135  ;;  %v85_v44 = vadd.f32 1e-06, %v83_v42 }
  0xa4   :  { %v88_v45 = vmul.f32 %v136_v43, %v84_v37 }
  0xa5   :  { %137 = vrcp.f32 %v85_v44 }
  0xa6   :  { %v90_v46 = vsub.f32 2.0, %v88_v45 }
  0xa8   :  { %v92_v48 = vmul.f32 %v136_v43, %v90_v46 }
  0xaa   :  { %v96_v50 = vmul.f32 %v95_v47, %v92_v48 }
  0xab   :  { %v138_v51 = vpop.eup %137 }
  0xac   :  { %v89_v53 = vmul.f32 %v138_v51, %v85_v44  ;;  %v100_v54 = vmul.f32 %v98_v49, %v96_v50 }
  0xae   :  { %v91_v55 = vsub.f32 2.0, %v89_v53  ;;  %v104_v56 = vadd.f32 %v103_v52, %v100_v54 }
  0xb0   :  { %v93_v57 = vmul.f32 %v138_v51, %v91_v55  ;;  %106 = vst.msk [vmem:[#allocation7] sm:$0xff] %vm35_vm0, %v104_v56 }
  0xb2   :  { %v97_v59 = vmul.f32 %v95_v47, %v93_v57 }
  0xb4   :  { %v101_v60 = vmul.f32 %v99_v58, %v97_v59 }
  0xb6   :  { %v105_v61 = vadd.f32 %v103_v52, %v101_v60 }
  0xb8   :  { %107 = vst.msk [vmem:[#allocation7 + $0x8] sm:$0xff] %vm35_vm0, %v105_v61 }
  0xb9   :  { %120 = dma.vmem_to_hbm [thread:$0]  %s113_s22, 256, %s115_s25, [#allocation6], %s192_s17, %s192_s17, %s193_s18  }
  0xba   :  { %189 = dma.done.wait [#allocation6], 256  }
  0xbb   :  { %190 = vsyncadd [#allocation6], 4294967040 }
  0xbc   :  { %125 = vsyncpa [#allocation5], 1 }
  0xbd   :  { %126 = vsyncpa [#allocation6], 1 }

</bundles_post_ra>
